<compile_context>
chip_gen: v7x
topology: tpu7x:2x2x1
jax: 0.10.0
libtpu: 0.0.40
codegen_flags: <defaults>
</compile_context>

<pallas_src>
import functools

import jax
import jax.numpy as jnp
from jax import lax
from jax.experimental import pallas as pl
from jax.experimental.pallas import tpu as pltpu

_LANE = 128
_MAX_TILE_ROWS = 8192          # 8192x128 f32 block = 4 MiB; 2x dbl-buffered inputs ~<= 34 MiB
_TARGET_STEP_BYTES = 1 << 20   # aim ~1 MiB of input per grid step
_NEG_PAD = -1e4                # sigmoid(-1e4) == 0 exactly in f32 -> neutral tail padding


def _cdiv(a, b):
    return (a + b - 1) // b


def _round_up(x, m):
    return _cdiv(x, m) * m


def _sublane_gran(dtype):
    # native sublane packing: f32 -> 8, bf16/f16 -> 16, int8 -> 32
    return max(1, 4 // jnp.dtype(dtype).itemsize) * 8


def _dice_kernel(out_ref, tgt_ref, loss_ref, num_acc, den_acc, *,
                 rows, tile_r, mask_rows, abs_target):
    """grid = (batch tiles, row tiles). Axis 1 is the reduction over the
    flattened per-sample feature axis. num/den partials live in vreg-sized
    (b_tile, 8, 128) scratch; cross-lane reduce happens once per sample."""
    j = pl.program_id(1)

    @pl.when(j == 0)
    def _():
        num_acc[...] = jnp.zeros_like(num_acc)
        den_acc[...] = jnp.zeros_like(den_acc)

    # hot path: sigmoid (EUP) + elementwise mul/add (VPU); no per-step XLU work
    p = jax.nn.sigmoid(out_ref[...].astype(jnp.float32))   # (b_tile, tile_r, 128)
    t = tgt_ref[...].astype(jnp.float32)

    if mask_rows:
        # last row tile is partial: zero out rows beyond the true row count
        # (jnp.where, not multiply, so garbage/NaN OOB reads cannot leak in).
        rows_left = rows - j * tile_r
        row_ids = lax.broadcasted_iota(jnp.int32, (tile_r, _LANE), 0)
        valid = (row_ids < rows_left)[None, :, :]
        p = jnp.where(valid, p, 0.0)
        t = jnp.where(valid, t, 0.0)

    b_tile = num_acc.shape[0]
    num_contrib = p * t                                     # |p| == p after sigmoid
    den_contrib = p + (jnp.abs(t) if abs_target else t)

    # Collapse tile rows -> 8 sublanes with pure vreg adds (no big accumulator
    # loads/stores); only the small (b_tile, 8, 128) scratch is updated.
    num_acc[...] += jnp.sum(
        num_contrib.reshape(b_tile, tile_r // 8, 8, _LANE), axis=1)
    den_acc[...] += jnp.sum(
        den_contrib.reshape(b_tile, tile_r // 8, 8, _LANE), axis=1)

    @pl.when(j == pl.num_programs(1) - 1)
    def _():
        smooth = jnp.float32(1.0)
        num = 2.0 * jnp.sum(num_acc[...], axis=(1, 2), keepdims=True) + smooth
        den = jnp.sum(den_acc[...], axis=(1, 2), keepdims=True) + smooth
        loss = 1.0 - num / den                              # (b_tile, 1, 1)
        loss_ref[...] = jnp.broadcast_to(loss, loss_ref.shape).astype(jnp.float32)


def binary_dice_loss(output, target, reduction="mean"):
    """BinaryDiceLoss forward with default module args
    (use_sigmoid=True, ignore_index=None, batch_dice=False).
    output/target: [N, *]. Returns scalar ('mean'/'sum') or [N] ('none')."""
    assert output.shape[0] == target.shape[0], "output & target batch size don't match"
    # TODO(synk): ignore_index / batch_dice / use_sigmoid=False paths not implemented.

    n = output.shape[0]

    # Logits: keep narrow float dtypes (bf16/f16) in HBM; widen to f32 per tile.
    if not jnp.issubdtype(output.dtype, jnp.floating):
        output = output.astype(jnp.float32)
    elif output.dtype == jnp.float64:
        output = output.astype(jnp.float32)

    # Targets: bool/int masks -> int8 in HBM (exact for 0/1 and small ints,
    # 1 B/elem); float targets kept in their dtype and widened per-tile.
    abs_target = True
    if target.dtype == jnp.bool_:
        target = target.astype(jnp.int8)
        abs_target = False                                  # provably non-negative
    elif jnp.issubdtype(target.dtype, jnp.unsignedinteger):
        target = target.astype(jnp.int8)
        abs_target = False
    elif jnp.issubdtype(target.dtype, jnp.integer):
        target = target.astype(jnp.int8)                    # exact in [-128, 127]
    elif target.dtype == jnp.float64:
        target = target.astype(jnp.float32)

    out_flat = output.reshape(n, -1)
    tgt_flat = target.reshape(n, -1)
    l = out_flat.shape[1]

    # Only pad the sub-128 tail (<=127 elems/sample) with neutral values:
    # logits -> -1e4 (sigmoid == 0), targets -> 0. Row remainders are handled
    # in-kernel with a mask (no full-array jnp.pad round trip through HBM).
    rows = _cdiv(l, _LANE)
    l_pad = rows * _LANE
    if l_pad != l:
        out_flat = jnp.pad(out_flat, ((0, 0), (0, l_pad - l)),
                           constant_values=_NEG_PAD)
        tgt_flat = jnp.pad(tgt_flat, ((0, 0), (0, l_pad - l)),
                           constant_values=0)
    out3 = out_flat.reshape(n, rows, _LANE)
    tgt3 = tgt_flat.reshape(n, rows, _LANE)

    # Balanced row tiles at the packed-dtype sublane granularity.
    row_gran = max(_sublane_gran(out3.dtype), _sublane_gran(tgt3.dtype))
    ntiles_r = _cdiv(rows, _MAX_TILE_ROWS)
    tile_r = _round_up(_cdiv(rows, ntiles_r), row_gran)
    num_row_tiles = _cdiv(rows, tile_r)
    mask_rows = (rows % tile_r) != 0

    # Batch tiling: ~1 MiB of input per grid step, but keep >=2 batch tiles
    # when n >= 2 so v7x's second TensorCore gets work via the 'parallel' axis.
    step_bytes = tile_r * _LANE * (out3.dtype.itemsize + tgt3.dtype.itemsize)
    b_tile = max(1, _TARGET_STEP_BYTES // max(step_bytes, 1))
    b_tile = min(b_tile, max(1, _cdiv(n, 2)), n, 256)
    num_batch_tiles = _cdiv(n, b_tile)

    kernel = functools.partial(_dice_kernel, rows=rows, tile_r=tile_r,
                               mask_rows=mask_rows, abs_target=abs_target)

    # VMEM budget: double-buffered input blocks + tiny accumulators + output.
    block_bytes = b_tile * tile_r * _LANE * (out3.dtype.itemsize + tgt3.dtype.itemsize)
    scratch_bytes = 2 * b_tile * 8 * _LANE * 4
    out_blk_bytes = 2 * b_tile * _LANE * 4
    needed_vmem = 2 * block_bytes + scratch_bytes + out_blk_bytes
    vmem_limit = int(min(64 * 1024 * 1024,
                         max(32 * 1024 * 1024, 2 * needed_vmem)))

    per_sample = pl.pallas_call(
        kernel,
        out_shape=jax.ShapeDtypeStruct((n, 1, _LANE), jnp.float32),
        grid_spec=pltpu.PrefetchScalarGridSpec(
            num_scalar_prefetch=0,
            grid=(num_batch_tiles, num_row_tiles),
            in_specs=[
                pl.BlockSpec((b_tile, tile_r, _LANE), lambda b, j: (b, j, 0)),
                pl.BlockSpec((b_tile, tile_r, _LANE), lambda b, j: (b, j, 0)),
            ],
            out_specs=pl.BlockSpec((b_tile, 1, _LANE), lambda b, j: (b, 0, 0)),
            scratch_shapes=[
                pltpu.VMEM((b_tile, 8, _LANE), jnp.float32),   # num partials
                pltpu.VMEM((b_tile, 8, _LANE), jnp.float32),   # den partials
            ],
        ),
        compiler_params=pltpu.CompilerParams(
            dimension_semantics=("parallel", "arbitrary"),
            vmem_limit_bytes=vmem_limit,
        ),
    )(out3, tgt3)

    per_sample = per_sample[:, 0, 0]
    if reduction == "mean":
        return per_sample.mean()
    elif reduction == "sum":
        return per_sample.sum()
    elif reduction == "none":
        return per_sample
    else:
        raise Exception("Unexpected reduction {}".format(reduction))


if __name__ == "__main__":
    def ref_loss(logits, tgt, reduction="mean"):
        nn_ = logits.shape[0]
        p = jax.nn.sigmoid(logits.reshape(nn_, -1).astype(jnp.float32))
        t = tgt.reshape(nn_, -1).astype(jnp.float32)
        num = 2.0 * jnp.sum(p * t, axis=1) + 1.0
        den = jnp.sum(jnp.abs(p) + jnp.abs(t), axis=1) + 1.0
        loss = 1.0 - num / den
        if reduction == "mean":
            return loss.mean()
        if reduction == "sum":
            return loss.sum()
        return loss

    key = jax.random.PRNGKey(0)
    k1, k2, k3, k4, k5, k6 = jax.random.split(key, 6)

    # case 1: [2,4,16,16] f32 logits, int {0,1} targets (int8 HBM path, row mask)
    N, C, H, W = 2, 4, 16, 16
    logits = jax.random.normal(k1, (N, C, H, W), dtype=jnp.float32)
    target = (jax.random.uniform(k2, (N, C, H, W)) > 0.5).astype(jnp.int32)
    loss = jax.block_until_ready(binary_dice_loss(logits, target, reduction="mean"))
    ref = ref_loss(logits, target, reduction="mean")
    assert jnp.allclose(loss, ref, rtol=1e-4, atol=1e-4), (loss, ref)

    # case 2: ragged L=105, float targets, 'none' (neutral tail pad + row mask)
    logits2 = jax.random.normal(k3, (2, 3, 7, 5), dtype=jnp.float32)
    target2 = (jax.random.uniform(k4, (2, 3, 7, 5)) > 0.5).astype(jnp.float32)
    loss2 = jax.block_until_ready(binary_dice_loss(logits2, target2, reduction="none"))
    ref2 = ref_loss(logits2, target2, reduction="none")
    assert jnp.allclose(loss2, ref2, rtol=1e-4, atol=1e-4), (loss2, ref2)

    # case 3: bf16 logits, bool targets, L=4096 (no pad, no mask), 'sum'
    logits3 = jax.random.normal(k5, (2, 4096), dtype=jnp.bfloat16)
    target3 = jax.random.uniform(k6, (2, 4096)) > 0.5
    loss3 = jax.block_until_ready(binary_dice_loss(logits3, target3, reduction="sum"))
    ref3 = ref_loss(logits3, target3, reduction="sum")
    assert jnp.allclose(loss3, ref3, rtol=1e-3, atol=1e-3), (loss3, ref3)

    print("KERNEL_OK")
</pallas_src>

<mosaic_0001>
module attributes {stable_mosaic.version = 11 : i64} {
  func.func @_dice_kernel(%arg0: i32, %arg1: i32, %arg2: memref<1x32x128xf32, #tpu.memory_space<vmem>>, %arg3: memref<1x32x128xi8, #tpu.memory_space<vmem>>, %arg4: memref<1x1x128xf32, #tpu.memory_space<vmem>>, %arg5: memref<1x8x128xf32, #tpu.memory_space<vmem>>, %arg6: memref<1x8x128xf32, #tpu.memory_space<vmem>>) attributes {dimension_semantics = [#tpu.dimension_semantics<parallel>, #tpu.dimension_semantics<arbitrary>], iteration_bounds = array<i64: 2, 1>, scalar_prefetch = 0 : i64, scratch_operands = 2 : i64, tpu.core_type = #tpu.core_type<tc>, window_params = [{transform_indices = @transform_0, window_bounds = array<i64: 1, 32, 128>}, {transform_indices = @transform_1, window_bounds = array<i64: 1, 32, 128>}, {transform_indices = @transform_2, window_bounds = array<i64: 1, 1, 128>}]} {
    %c0_i32 = arith.constant 0 : i32
    %0 = arith.cmpi eq, %arg1, %c0_i32 : i32
    %1 = arith.extui %0 : i1 to i32
    %c0_i32_0 = arith.constant 0 : i32
    %2 = arith.cmpi ne, %1, %c0_i32_0 : i32
    scf.if %2 {
      %cst_24 = arith.constant 0.000000e+00 : f32
      %37 = vector.broadcast %cst_24 : f32 to vector<1x8x128xf32>
      %c0_25 = arith.constant 0 : index
      %c0_26 = arith.constant 0 : index
      %c0_27 = arith.constant 0 : index
      %38 = vector.load %arg5[%c0_25, %c0_26, %c0_27] : memref<1x8x128xf32, #tpu.memory_space<vmem>>, vector<1x8x128xf32>
      tpu.vector_store %arg5[%c0_25, %c0_26, %c0_27], %37 {strides = array<i32>} : memref<1x8x128xf32, #tpu.memory_space<vmem>>, vector<1x8x128xf32>,
      %cst_28 = arith.constant 0.000000e+00 : f32
      %39 = vector.broadcast %cst_28 : f32 to vector<1x8x128xf32>
      %c0_29 = arith.constant 0 : index
      %c0_30 = arith.constant 0 : index
      %c0_31 = arith.constant 0 : index
      %40 = vector.load %arg6[%c0_29, %c0_30, %c0_31] : memref<1x8x128xf32, #tpu.memory_space<vmem>>, vector<1x8x128xf32>
      tpu.vector_store %arg6[%c0_29, %c0_30, %c0_31], %39 {strides = array<i32>} : memref<1x8x128xf32, #tpu.memory_space<vmem>>, vector<1x8x128xf32>,
    } else {
    }
    %c0 = arith.constant 0 : index
    %c0_1 = arith.constant 0 : index
    %c0_2 = arith.constant 0 : index
    %3 = vector.load %arg2[%c0, %c0_1, %c0_2] : memref<1x32x128xf32, #tpu.memory_space<vmem>>, vector<1x32x128xf32>
    %4 = arith.negf %3 : vector<1x32x128xf32>
    %5 = math.exp %4 : vector<1x32x128xf32>
    %cst = arith.constant 1.000000e+00 : f32
    %6 = vector.broadcast %cst : f32 to vector<1x32x128xf32>
    %7 = arith.addf %6, %5 : vector<1x32x128xf32>
    %8 = arith.divf %6, %7 : vector<1x32x128xf32>
    %c0_3 = arith.constant 0 : index
    %c0_4 = arith.constant 0 : index
    %c0_5 = arith.constant 0 : index
    %9 = vector.load %arg3[%c0_3, %c0_4, %c0_5] : memref<1x32x128xi8, #tpu.memory_space<vmem>>, vector<1x32x128xi8>
    %10 = arith.sitofp %9 : vector<1x32x128xi8> to vector<1x32x128xf32>
    %c32_i32 = arith.constant 32 : i32
    %11 = arith.muli %arg1, %c32_i32 : i32
    %c8_i32 = arith.constant 8 : i32
    %12 = arith.subi %c8_i32, %11 : i32
    %13 = tpu.iota {dimensions = array<i32: 0>} : vector<32x128xi32>
    %14 = vector.broadcast %12 : i32 to vector<32x128xi32>
    %15 = arith.cmpi slt, %13, %14 : vector<32x128xi32>
    %16 = vector.shape_cast %15 : vector<32x128xi1> to vector<1x32x128xi1>
    %cst_6 = arith.constant 0.000000e+00 : f32
    %17 = vector.broadcast %cst_6 : f32 to vector<1x32x128xf32>
    %18 = arith.select %16, %8, %17 : vector<1x32x128xi1>, vector<1x32x128xf32>
    %cst_7 = arith.constant 0.000000e+00 : f32
    %19 = vector.broadcast %cst_7 : f32 to vector<1x32x128xf32>
    %20 = arith.select %16, %10, %19 : vector<1x32x128xi1>, vector<1x32x128xf32>
    %21 = arith.mulf %18, %20 : vector<1x32x128xf32>
    %22 = math.absf %20 : vector<1x32x128xf32>
    %23 = arith.addf %18, %22 : vector<1x32x128xf32>
    %c0_8 = arith.constant 0 : index
    %c0_9 = arith.constant 0 : index
    %c0_10 = arith.constant 0 : index
    %24 = vector.load %arg5[%c0_8, %c0_9, %c0_10] : memref<1x8x128xf32, #tpu.memory_space<vmem>>, vector<1x8x128xf32>
    %25 = vector.shape_cast %21 : vector<1x32x128xf32> to vector<1x4x8x128xf32>
    %cst_11 = arith.constant dense<0.000000e+00> : vector<1x8x128xf32>
    %26 = vector.multi_reduction <add>, %25, %cst_11 [1] : vector<1x4x8x128xf32> to vector<1x8x128xf32>
    %27 = arith.addf %24, %26 : vector<1x8x128xf32>
    %c0_12 = arith.constant 0 : index
    %c0_13 = arith.constant 0 : index
    %c0_14 = arith.constant 0 : index
    %28 = vector.load %arg5[%c0_12, %c0_13, %c0_14] : memref<1x8x128xf32, #tpu.memory_space<vmem>>, vector<1x8x128xf32>
    tpu.vector_store %arg5[%c0_12, %c0_13, %c0_14], %27 {strides = array<i32>} : memref<1x8x128xf32, #tpu.memory_space<vmem>>, vector<1x8x128xf32>,
    %c0_15 = arith.constant 0 : index
    %c0_16 = arith.constant 0 : index
    %c0_17 = arith.constant 0 : index
    %29 = vector.load %arg6[%c0_15, %c0_16, %c0_17] : memref<1x8x128xf32, #tpu.memory_space<vmem>>, vector<1x8x128xf32>
    %30 = vector.shape_cast %23 : vector<1x32x128xf32> to vector<1x4x8x128xf32>
    %cst_18 = arith.constant dense<0.000000e+00> : vector<1x8x128xf32>
    %31 = vector.multi_reduction <add>, %30, %cst_18 [1] : vector<1x4x8x128xf32> to vector<1x8x128xf32>
    %32 = arith.addf %29, %31 : vector<1x8x128xf32>
    %c0_19 = arith.constant 0 : index
    %c0_20 = arith.constant 0 : index
    %c0_21 = arith.constant 0 : index
    %33 = vector.load %arg6[%c0_19, %c0_20, %c0_21] : memref<1x8x128xf32, #tpu.memory_space<vmem>>, vector<1x8x128xf32>
    tpu.vector_store %arg6[%c0_19, %c0_20, %c0_21], %32 {strides = array<i32>} : memref<1x8x128xf32, #tpu.memory_space<vmem>>, vector<1x8x128xf32>,
    %c0_i32_22 = arith.constant 0 : i32
    %34 = arith.cmpi eq, %arg1, %c0_i32_22 : i32
    %35 = arith.extui %34 : i1 to i32
    %c0_i32_23 = arith.constant 0 : i32
    %36 = arith.cmpi ne, %35, %c0_i32_23 : i32
    scf.if %36 {
      %c0_24 = arith.constant 0 : index
      %c0_25 = arith.constant 0 : index
      %c0_26 = arith.constant 0 : index
      %37 = vector.load %arg5[%c0_24, %c0_25, %c0_26] : memref<1x8x128xf32, #tpu.memory_space<vmem>>, vector<1x8x128xf32>
      %cst_27 = arith.constant dense<0.000000e+00> : vector<1xf32>
      %38 = vector.multi_reduction <add>, %37, %cst_27 [1, 2] : vector<1x8x128xf32> to vector<1xf32>
      %39 = vector.shape_cast %38 : vector<1xf32> to vector<1x1x1xf32>
      %cst_28 = arith.constant 2.000000e+00 : f32
      %40 = vector.broadcast %cst_28 : f32 to vector<1x1x1xf32>
      %41 = arith.mulf %40, %39 : vector<1x1x1xf32>
      %cst_29 = arith.constant 1.000000e+00 : f32
      %42 = vector.broadcast %cst_29 : f32 to vector<1x1x1xf32>
      %43 = arith.addf %41, %42 : vector<1x1x1xf32>
      %c0_30 = arith.constant 0 : index
      %c0_31 = arith.constant 0 : index
      %c0_32 = arith.constant 0 : index
      %44 = vector.load %arg6[%c0_30, %c0_31, %c0_32] : memref<1x8x128xf32, #tpu.memory_space<vmem>>, vector<1x8x128xf32>
      %cst_33 = arith.constant dense<0.000000e+00> : vector<1xf32>
      %45 = vector.multi_reduction <add>, %44, %cst_33 [1, 2] : vector<1x8x128xf32> to vector<1xf32>
      %46 = vector.shape_cast %45 : vector<1xf32> to vector<1x1x1xf32>
      %cst_34 = arith.constant 1.000000e+00 : f32
      %47 = vector.broadcast %cst_34 : f32 to vector<1x1x1xf32>
      %48 = arith.addf %46, %47 : vector<1x1x1xf32>
      %49 = arith.divf %43, %48 : vector<1x1x1xf32>
      %cst_35 = arith.constant 1.000000e+00 : f32
      %50 = vector.broadcast %cst_35 : f32 to vector<1x1x1xf32>
      %51 = arith.subf %50, %49 : vector<1x1x1xf32>
      %52 = vector.shape_cast %51 : vector<1x1x1xf32> to vector<1x1x1xf32>
      %53 = vector.broadcast %52 : vector<1x1x1xf32> to vector<1x1x128xf32>
      %c0_36 = arith.constant 0 : index
      %c0_37 = arith.constant 0 : index
      %c0_38 = arith.constant 0 : index
      %54 = vector.load %arg4[%c0_36, %c0_37, %c0_38] : memref<1x1x128xf32, #tpu.memory_space<vmem>>, vector<1x1x128xf32>
      tpu.vector_store %arg4[%c0_36, %c0_37, %c0_38], %53 {strides = array<i32>} : memref<1x1x128xf32, #tpu.memory_space<vmem>>, vector<1x1x128xf32>,
    } else {
    }
    return
  }
  func.func @transform_0(%arg0: i32, %arg1: i32) -> (i32, i32, i32) {
    %c0_i32 = arith.constant 0 : i32
    %c0_i32_0 = arith.constant 0 : i32
    return %arg0, %arg1, %c0_i32 : i32, i32, i32
  }
  func.func @transform_1(%arg0: i32, %arg1: i32) -> (i32, i32, i32) {
    %c0_i32 = arith.constant 0 : i32
    %c0_i32_0 = arith.constant 0 : i32
    return %arg0, %arg1, %c0_i32 : i32, i32, i32
  }
  func.func @transform_2(%arg0: i32, %arg1: i32) -> (i32, i32, i32) {
    %c0_i32 = arith.constant 0 : i32
    %c0_i32_0 = arith.constant 0 : i32
    %c0_i32_1 = arith.constant 0 : i32
    return %arg0, %c0_i32, %c0_i32_0 : i32, i32, i32
  }
}

</mosaic_0001>

<bundles_post_ra>
// kernel: tpu_custom_call.1
= control target key start
LH: loop header
LB: loop body
LE: loop exit
PB: predicated region body
PF: predicated region fallthrough
CT: control target
= control target key end

     0   :  { %7 = vsyncpa [#allocation5], 0  ;;  %s892_s0 = inlined_call_operand.hbm [shape: f32[2,8,128], index: 0, kind: input, shape index: {}]   ;;  %s893_s1 = inlined_call_operand.hbm [shape: s8[2,8,128], index: 1, kind: input, shape index: {}]   ;;  %s894_s2 = inlined_call_operand.hbm [shape: f32[2,1,128], index: 2, kind: output, shape index: {}]  }
   0x1   :  { %9 = vsyncpa [#allocation5 + $0x1], 0 }
   0x2   :  { %10 = vsyncpa [#allocation8], 0 }
   0x3   :  { %12 = vsyncpa [#allocation8 + $0x1], 0 }
   0x4   :  { %13 = vsyncpa [#allocation6], 0 }
   0x5   :  { %15 = vsyncpa [#allocation6 + $0x1], 0  ;;  %s708_s9 = smov 0   ;;  %s710_s10 = smov 0  }
   0x6   :  { %s712_s11 = smov 0   ;;  %s714_s12 = smov 0  }
   0x7   :  { %s716_s13 = smov 0   ;;  %s718_s14 = smov 0  }
   0x8 LB: > { %s465_s15 = sadd.s32 4294967295, %s684_s14   ;;  %s466_s16 = sadd.s32 4294967294, %s684_s14   ;;  %s684_s14 = sphi %s718_s14, %s21_s14   ;;  %s680_s13 = sphi %s716_s13, %s908_s13   ;;  %s676_s12 = sphi %s714_s12, %s907_s12   ;;  %s672_s11 = sphi %s712_s11, %s906_s11   ;;  %s668_s10 = sphi %s710_s10, %s905_s10   ;;  %s664_s9 = sphi %s708_s9, %s904_s9  }
   0x9   : > { %s33_s17 = sadd.s32 1, %s680_s13  ;;  %s42_s18 = sadd.s32 1, %s672_s11 }
   0xa   : > { %p35_p0 = scmp.ge.s32.totalorder %s33_s17, 2  ;;  %p49_p1 = scmp.ne.s32.totalorder %s672_s11, %s668_s10 }
   0xb   : > { %p50_p2 = scmp.eq.s32.totalorder %s684_s14, 0  ;;  %p55_p3 = scmp.ne.s32.totalorder %s668_s10, %s664_s9 }
   0xc   : > { %s910_s17 = smov (%p35_p0, %s33_s17), 0  ;;  %p56_p5 = scmp.eq.s32.totalorder %s465_s15, 0 }
   0xd   : > { %p749_p4 = por %p50_p2, %p49_p1  ;;  %s37_s20 = ssub.s32 %s680_s13, %s910_s17 }
   0xe   : > { %p107_p6 = scmp.eq.s32.totalorder %s465_s15, 1  ;;  %p40_p7 = scmp.eq.s32.totalorder %s37_s20, 0 }
   0xf   : > { %p755_p8 = por %p56_p5, %p55_p3  ;;  %p113_p10 = scmp.eq.s32.totalorder %s466_s16, 1 }
  0x10   : > { %p759_p9 = por %p107_p6, %p49_p1  ;;  %p895_p12 = scmp.ge.s32.totalorder %s684_s14, 2 }
  0x11   : > { %s764_s23 = scalar_select %p40_p7, %s672_s11, %s42_s18  }
  0x12   : > { %s899_s22 = scalar_select %p759_p9, 1, 0 }
  0x13   : > { %p766_p11 = por %p113_p10, %p55_p3  ;;  %129 = sbr.rel (%p895_p12) target bundleno = 88 (0x58), region = 16 }
  0x15   : > { %s900_s24 = scalar_select %p766_p11, 1, 0 }
  0x1a   : > { %132 = sbr.rel (!%p749_p4) target bundleno = 57 (0x39), region = 20  ;;  %s133_s25 = sand.u32 (%p749_p4), 1, %s672_s11  }
  0x1b   : > { %s469_s26 = sshll.u32 (%p749_p4), %s133_s25, 5  ;;  %s776_s27 = scalar_lea.sflag (%p749_p4), [#allocation5], %s133_s25 }
  0x1c   : > { %s137_s28 = scalar_lea.vmem (%p749_p4), [#allocation4], %s469_s26 }
  0x21   : > { %143 = vsyncadd %s776_s27, 384  ;;  %s470_s29 = sshll.u32 %s680_s13, 7  ;;  %s149_s30 = sshll.u32 %s137_s28, 4  ;;  %s150_s30 = int_to_ptr.vmem [resolvable:$true] %s149_s30 }
  0x22   : > { %s783_s5 = scalar_lea.hbm %s892_s0, %s470_s29  ;;  %s552_s15 = scalar_lea.hbm %s892_s0, 256 }
  0x23   : > { %s550_s6 = scalar_lea.hbm %s783_s5, 128  ;;  %p553_p0 = scmp.lt.u32.totalorder %s783_s5, %s892_s0 }
  0x24   : > { %p551_p13 = scmp.ne.s32.totalorder %s783_s5, %s550_s6  ;;  %p554_p1 = scmp.lt.u32.totalorder %s552_s15, %s550_s6 }
  0x25   : > { %p556_p3 = scmp.lt.u32.totalorder %s550_s6, %s783_s5 }
  0x26   : > { %p555_p2 = por %p554_p1, %p553_p0 }
  0x28   : > { %p557_p5 = por %p556_p3, %p555_p2 }
  0x2a   : > { %p558_p6 = pnand %p557_p5, %p551_p13 }
  0x2c   : > { %561 = shalt.err (!%p558_p6)
}
  0x2d   : > { %s562_s20 = scalar_lea.vmem %s150_s30, 128  ;;  %s686_s25 = smov [#allocation4]  }
  0x2e   : > { %p563_p7 = scmp.ne.s32.totalorder %s150_s30, %s562_s20  ;;  %s564_s26 = sshll.u32 %s686_s25, 4  ;;  %s565_s26 = int_to_ptr.vmem [resolvable:$false] %s564_s26 }
  0x2f   : > { %s566_s28 = scalar_lea.vmem %s565_s26, 1024  ;;  %p567_p10 = scmp.lt.s32.totalorder %s150_s30, %s565_s26 }
  0x30   : > { %p568_p12 = scmp.lt.s32.totalorder %s566_s28, %s562_s20 }
  0x32   : > { %p569_p11 = por %p568_p12, %p567_p10 }
  0x34   : > { %p570_p9 = pnand %p569_p11, %p563_p7 }
  0x36   : > { %573 = shalt.err (!%p570_p9)
}
  0x37   : > { %s687_s29 = smov 128   ;;  %s688_s3 = smov 8  }
  0x38   : > { %155 = dma.hbm_to_vmem [thread:$0]  %s783_s5, 128, %s150_s30, %s776_s27, %s687_s29, %s687_s29, %s688_s3  }
  0x39 PF: > { %158 = sbr.rel (!%p749_p4) target bundleno = 88 (0x58), region = 24  ;;  %s159_s4 = sand.u32 (%p749_p4), 1, %s672_s11  }
  0x3a   : > { %s471_s6 = sshll.u32 (%p749_p4), %s159_s4, 3  ;;  %s800_s7 = scalar_lea.sflag (%p749_p4), [#allocation8], %s159_s4 }
  0x3b   : > { %s163_s8 = scalar_lea.vmem (%p749_p4), [#allocation7], %s471_s6 }
  0x40   : > { %169 = vsyncadd %s800_s7, 96  ;;  %s472_s15 = sshll.u32 %s680_s13, 5  ;;  %s175_s16 = sshll.u32 %s163_s8, 4  ;;  %s176_s16 = int_to_ptr.vmem [resolvable:$true] %s175_s16 }
  0x41   : > { %s807_s25 = scalar_lea.hbm %s893_s1, %s472_s15  ;;  %s576_s5 = scalar_lea.hbm %s893_s1, 64 }
  0x42   : > { %s574_s19 = scalar_lea.hbm %s807_s25, 32  ;;  %p577_p9 = scmp.lt.u32.totalorder %s807_s25, %s893_s1 }
  0x43   : > { %p575_p4 = scmp.ne.s32.totalorder %s807_s25, %s574_s19  ;;  %p578_p11 = scmp.lt.u32.totalorder %s576_s5, %s574_s19 }
  0x44   : > { %p580_p13 = scmp.lt.u32.totalorder %s574_s19, %s807_s25 }
  0x45   : > { %p579_p12 = por %p578_p11, %p577_p9 }
  0x47   : > { %p581_p0 = por %p580_p13, %p579_p12 }
  0x49   : > { %p582_p1 = pnand %p581_p0, %p575_p4 }
  0x4b   : > { %585 = shalt.err (!%p582_p1)
}
  0x4c   : > { %s586_s29 = scalar_lea.vmem %s176_s16, 32  ;;  %s689_s3 = smov [#allocation7]  }
  0x4d   : > { %p587_p2 = scmp.ne.s32.totalorder %s176_s16, %s586_s29  ;;  %s588_s4 = sshll.u32 %s689_s3, 4  ;;  %s589_s4 = int_to_ptr.vmem [resolvable:$false] %s588_s4 }
  0x4e   : > { %s590_s6 = scalar_lea.vmem %s589_s4, 256  ;;  %p591_p3 = scmp.lt.s32.totalorder %s176_s16, %s589_s4 }
  0x4f   : > { %p592_p5 = scmp.lt.s32.totalorder %s590_s6, %s586_s29 }
  0x51   : > { %p593_p6 = por %p592_p5, %p591_p3 }
  0x53   : > { %p594_p7 = pnand %p593_p6, %p587_p2 }
  0x55   : > { %597 = shalt.err (!%p594_p7)
}
  0x56   : > { %s690_s8 = smov 32   ;;  %s691_s15 = smov 2  }
  0x57   : > { %181 = dma.hbm_to_vmem [thread:$0]  %s807_s25, 32, %s176_s16, %s800_s7, %s690_s8, %s690_s8, %s691_s15  }
  0x58 PF: > { %p473_p10 = scmp.ge.s32.totalorder %s684_s14, 1  ;;  %p183_p4 = scmp.lt.s32.totalorder %s684_s14, 3 }
  0x5a   : > { %p184_p9 = pnand %p473_p10, %p183_p4 }
  0x5b   : > { %s824_s18 = sand.u32 (!%p184_p9), 1, %s668_s10  }
  0x5c   : > { %187 = sbr.rel (%p184_p9) target bundleno = 317 (0x13d), region = 28  ;;  %s474_s20 = sshll.u32 (!%p184_p9), %s824_s18, 5 }
  0x5d   : > { %s190_s19 = scalar_lea.sflag (!%p184_p9), [#allocation5], %s824_s18  ;;  %s193_s27 = scalar_lea.vmem (!%p184_p9), [#allocation4], %s474_s20 }
  0x63   : > { %651 = dma.done.wait (%p755_p8), %s190_s19, 512  }
  0x64   : > { %653 = vsyncadd (%p755_p8), %s190_s19, 4294966784  ;;  %s475_s7 = sshll.u32 %s824_s18, 3  ;;  %s199_s16 = scalar_lea.sflag [#allocation8], %s824_s18 }
  0x65   : > { %s202_s25 = scalar_lea.vmem [#allocation7], %s475_s7 }
  0x66   : > { %655 = dma.done.wait (%p755_p8), %s199_s16, 128  }
  0x67   : > { %657 = vsyncadd (%p755_p8), %s199_s16, 4294967168  ;;  %v239_v0 = vld [vmem:[%s193_s27] sm:$0xff]  ;;  %s480_s21 = sshll.u32 %s676_s12, 4  ;;  %s226_s30 = scalar_lea.vmem [#allocation9], %s824_s18 }
  0x68   : > { %v476_v1 = vmul.f32 -1.442695, %v239_v0  ;;  %v267_v2 = vld [vmem:[%s202_s25] sm:$0x3]  ;;  %s364_s5 = sshll.u32 %s226_s30, 4  ;;  %s843_s29 = scalar_lea.hbm %s894_s2, %s480_s21  ;;  %s845_s5 = int_to_ptr.vmem [resolvable:$true] %s364_s5 }
  0x69   : > { %v271_v5 = vunpack.c.0.s8 %v267_v2  ;;  %s352_s3 = scalar_lea.sflag [#allocation6], %s824_s18  ;;  %s598_s4 = scalar_lea.vmem %s845_s5, 16 }
  0x6a   : > { %544 = vpow2.f32 %v476_v1  ;;  %p599_p8 = scmp.ne.s32.totalorder %s845_s5, %s598_s4  ;;  %p901_p11 = scmp.ne.s32.totalorder %s899_s22, 0 }
  0x6b   : > { %v275_v6 = vcvt.s32.f32 %v271_v5  ;;  %s692_s12 = smov [#allocation9]  }
  0x6c   : > { %p600_p12 = pnand %p599_p8, %p901_p11  ;;  %s602_s6 = sshll.u32 %s692_s12, 4  ;;  %s603_s6 = int_to_ptr.vmem [resolvable:$false] %s602_s6 }
  0x6d   : > { %v303_v7 = vand.u32 2147483647, %v275_v6  ;;  %s604_s8 = scalar_lea.vmem %s603_s6, 32  ;;  %p605_p0 = scmp.lt.s32.totalorder %s845_s5, %s603_s6 }
  0x6e   : > { %p601_p13 = pneg %p600_p12  ;;  %p606_p1 = scmp.lt.s32.totalorder %s604_s8, %s598_s4 }
  0x70   : > { %p607_p2 = por %p606_p1, %p605_p0 }
  0x72   : > { %p608_p3 = pnand %p607_p2, %p601_p13 }
  0x74   : > { %v545_v3 = vpop.eup %544 }
  0x75   : > { %v255_v4 = vadd.f32 1.0, %v545_v3 }
  0x77   : > { %546 = vrcp.f32 %v255_v4 }
  0x81   : > { %v547_v8 = vpop.eup %546 }
  0x82   : > { %v307_v9 = vadd.f32 %v547_v8, %v303_v7  ;;  %v299_v10 = vmul.f32 %v547_v8, %v275_v6 }
  0x84   : > { %338 = vadd.xlane.f32.xlu0 %v307_v9 }
  0x88   : > { %327 = vadd.xlane.f32.xlu0 %v299_v10 }
 0x111   : > { %v339_v11 = vpop.xlane.xlu0 %338 }
 0x112   : > { %v340_v12 = vrot.slane %v339_v11, 4 }
 0x114   : > { %v341_v13 = vadd.f32 %v340_v12, %v339_v11 }
 0x115   : > { %v328_v14 = vpop.xlane.xlu0 %327 }
 0x116   : > { %v342_v15 = vrot.slane %v341_v13, 2  ;;  %v329_v16 = vrot.slane %v328_v14, 4 }
 0x118   : > { %v343_v17 = vadd.f32 %v342_v15, %v341_v13  ;;  %v330_v18 = vadd.f32 %v329_v16, %v328_v14 }
 0x11a   : > { %v344_v19 = vrot.slane %v343_v17, 1  ;;  %v331_v20 = vrot.slane %v330_v18, 2 }
 0x11c   : > { %v345_v21 = vadd.f32 %v344_v19, %v343_v17  ;;  %v332_v22 = vadd.f32 %v331_v20, %v330_v18 }
 0x11e   : > { %v346_v23 = vadd.f32 1.0, %v345_v21  ;;  %v333_v24 = vrot.slane %v332_v22, 1 }
 0x120   : > { %548 = vrcp.f32 %v346_v23  ;;  %v334_v25 = vadd.f32 %v333_v24, %v332_v22 }
 0x122   : > { %v335_v26 = vmul.f32 2.0, %v334_v25 }
 0x124   : > { %v336_v27 = vadd.f32 1.0, %v335_v26 }
 0x12a   : > { %v549_v28 = vpop.eup %548 }
 0x12b   : > { %v348_v29 = vmul.f32 %v549_v28, %v336_v27 }
 0x12d   : > { %v349_v30 = vsub.f32 1.0, %v348_v29 }
 0x12f   : > { %350 = vst [vmem:[%s226_s30] sm:$0x1] %v349_v30 }
 0x130   : > { %611 = shalt.err (!%p608_p3)
}
 0x131   : > { %s612_s15 = scalar_lea.hbm %s843_s29, 16  ;;  %s616_s19 = scalar_lea.hbm %s894_s2, 32 }
 0x132   : > { %p613_p5 = scmp.ne.s32.totalorder %s843_s29, %s612_s15  ;;  %p617_p10 = scmp.lt.u32.totalorder %s843_s29, %s894_s2 }
 0x133   : > { %p618_p4 = scmp.lt.u32.totalorder %s616_s19, %s612_s15  ;;  %p620_p8 = scmp.lt.u32.totalorder %s612_s15, %s843_s29 }
 0x134   : > { %p614_p6 = pnand %p613_p5, %p901_p11 }
 0x135   : > { %p619_p9 = por %p618_p4, %p617_p10 }
 0x136   : > { %p615_p7 = pneg %p614_p6 }
 0x137   : > { %p621_p12 = por %p620_p8, %p619_p9 }
 0x139   : > { %p622_p13 = pnand %p621_p12, %p615_p7 }
 0x13b   : > { %625 = shalt.err (!%p622_p13)
}
 0x13c   : > { %485 = dma.vmem_to_hbm [thread:$0]  (%p901_p11), %s845_s5, 16, %s843_s29, %s352_s3  }
 0x13d PF: > { %s376_s16 = sand.u32 1, %s664_s9   ;;  %p902_p0 = scmp.ne.s32.totalorder %s900_s24, 0 }
 0x13e   : > { %p903_p1 = scmp.ge.s32.totalorder %s684_s14, 2  ;;  %s377_s25 = scalar_lea.sflag [#allocation6], %s376_s16 }
 0x140   : > { %p488_p2 = pnand %p903_p1, %p902_p0 }
 0x142   : > { %659 = dma.done.wait (!%p488_p2), %s377_s25, 16  }
 0x143   : > { %661 = vsyncadd (!%p488_p2), %s377_s25, 4294967280  ;;  %s21_s14 = sadd.s32 1, %s684_s14   ;;  %s904_s9 = smov %s668_s10 }
 0x144   : > { %p18_p3 = scmp.ge.s32.totalorder %s21_s14, 4   ;;  %s905_s10 = smov %s672_s11 }
 0x145   : > { %s906_s11 = smov %s764_s23  ;;  %s907_s12 = smov %s680_s13 }
 0x146   : > { %s908_s13 = smov %s910_s17  ;;  %20 = sbr.rel (!%p18_p3) target bundleno = 8 (0x8), region = 94 }
 0x14d   :  { %381 = vsyncpa [#allocation5], 1 }
 0x14e   :  { %383 = vsyncpa [#allocation5 + $0x1], 1 }
 0x14f   :  { %384 = vsyncpa [#allocation8], 1 }
 0x150   :  { %386 = vsyncpa [#allocation8 + $0x1], 1 }
 0x151   :  { %387 = vsyncpa [#allocation6], 1 }
 0x152   :  { %389 = vsyncpa [#allocation6 + $0x1], 1 }

</bundles_post_ra>
